<compile_context>
chip_gen: v6e
topology: v6e:2x2x1
jax: 0.10.0
libtpu: 0.0.40
codegen_flags: <defaults>
</compile_context>

<pallas_src>
import functools
import math

import jax
import jax.numpy as jnp
from jax.experimental import pallas as pl
from jax.experimental.pallas import tpu as pltpu


def _rmsnorm_kernel(scale_ref, x_ref, o_ref, *, eps):
    # Squared-mean reduction always accumulated in f32 (numerics).
    xf = x_ref[...].astype(jnp.float32)                 # f32 view only for the reduce
    ms = jnp.mean(xf * xf, axis=-1, keepdims=True)      # (tm, 1): XLU cross-lane reduce
    inv = jax.lax.rsqrt(ms + eps)                       # EUP rsqrt: own VLIW slot
    # Final scale pass in the input dtype; re-read x_ref so the full-tile f32 copy is
    # not kept live across the store (frees ~1 tile of scratch / vreg pressure).
    inv_c = inv.astype(x_ref.dtype)
    o_ref[...] = ((x_ref[...] * inv_c) * scale_ref[...]).astype(o_ref.dtype)


def _round_up(n, m):
    return ((n + m - 1) // m) * m


def _pick_block_rows(rows, dim, itemsize, target_tile_bytes=2 << 20, min_steps=8):
    """Row tile for HBM streaming: ~2 MiB per buffer, >= min_steps (even) grid steps."""
    bytes_per_row = max(dim * itemsize, 1)
    block_rows = max(1, target_tile_bytes // bytes_per_row)
    # Keep at least `min_steps` grid steps so v7x's two TensorCores get balanced work
    # and the pipeline has enough stages to hide prologue/epilogue DMA.
    block_rows = min(block_rows, max(rows // min_steps, 1))
    block_rows = max(8, (block_rows // 8) * 8)           # sublane-tile multiple
    block_rows = min(block_rows, _round_up(rows, 8))     # don't exceed the problem
    # Best-effort nudge to an even step count (2 TCs on v7x; harmless on v5e/v6e).
    steps = -(-rows // block_rows)
    if steps > 1 and steps % 2 == 1:
        steps += 1
        block_rows = min(block_rows, max(8, _round_up(-(-rows // steps), 8)))
    return block_rows


def _vmem_limit_bytes(block_rows, dim, itemsize, input_buffers):
    """Scoped-VMEM budget from actual tile usage (+25% margin), not physical capacity."""
    tile = block_rows * dim * itemsize
    f32_tmp = block_rows * dim * 4                 # f32 copy used by the squared reduce
    scale_buf = _round_up(dim, 128) * itemsize
    need = (input_buffers + 2) * tile + f32_tmp + scale_buf
    need = int(need * 1.25) + (1 << 20)            # margin + compiler-scratch headroom
    return max(8 << 20, min(need, 48 << 20))       # well inside v7x's 64 MiB/TC


def rmsnorm(x, scale, eps=1e-6, block_rows=None, input_buffers=2, inplace=False):
    """RMSNorm over the last dim. x: (..., dim), scale: (dim,). Same shape/dtype as x."""
    orig_shape = x.shape
    dim = orig_shape[-1]
    rows = math.prod(orig_shape[:-1]) if len(orig_shape) > 1 else 1
    x2d = x.reshape(rows, dim)
    # Pre-cast scale once in the wrapper (drops a per-grid-step cast in the kernel).
    scale2d = scale.astype(x.dtype).reshape(1, dim)

    itemsize = jnp.dtype(x.dtype).itemsize
    if block_rows is None:
        block_rows = _pick_block_rows(rows, dim, itemsize)

    grid = (pl.cdiv(rows, block_rows),)
    vmem_limit = _vmem_limit_bytes(block_rows, dim, itemsize, input_buffers)

    x_spec_kwargs = {}
    if input_buffers != 2:
        # Optional deeper input pipelining; enable only if a profile shows exposed DMA.
        x_spec_kwargs["pipeline_mode"] = pl.Buffered(input_buffers)

    call_kwargs = {}
    if inplace:
        # Footprint-only win (bytes moved unchanged): write the output over x's buffer.
        call_kwargs["input_output_aliases"] = {1: 0}

    out = pl.pallas_call(
        functools.partial(_rmsnorm_kernel, eps=eps),
        out_shape=jax.ShapeDtypeStruct((rows, dim), x.dtype),
        grid_spec=pltpu.PrefetchScalarGridSpec(
            num_scalar_prefetch=0,
            grid=grid,
            in_specs=[
                pl.BlockSpec((1, dim), lambda i: (0, 0)),            # scale: resident
                pl.BlockSpec((block_rows, dim), lambda i: (i, 0),    # x row tile
                             **x_spec_kwargs),
            ],
            out_specs=pl.BlockSpec((block_rows, dim), lambda i: (i, 0)),
        ),
        compiler_params=pltpu.CompilerParams(
            dimension_semantics=("parallel",),  # shards row-tiles across TCs on v7x
            vmem_limit_bytes=vmem_limit,
        ),
        **call_kwargs,
    )(scale2d, x2d)

    return out.reshape(orig_shape)


def rmsnorm_ref(x, scale, eps=1e-6):
    rms = jnp.sqrt(jnp.mean(x.astype(jnp.float32) ** 2, axis=-1, keepdims=True) + eps)
    return (scale * x / rms).astype(x.dtype)


if __name__ == "__main__":
    key = jax.random.PRNGKey(0)
    k0, k1, k2 = jax.random.split(key, 3)

    # Main demo: matches the PyTorch module (scale initialized to ones).
    batch, seq, dim = 2, 8, 32
    x = jax.random.normal(k0, (batch, seq, dim), dtype=jnp.float32)
    scale = jnp.ones((dim,), dtype=jnp.float32)

    y = rmsnorm(x, scale, eps=1e-6)
    jax.block_until_ready(y)

    y_ref = rmsnorm_ref(x, scale, eps=1e-6)
    assert y.shape == x.shape and y.dtype == x.dtype
    assert jnp.allclose(y, y_ref, atol=1e-5, rtol=1e-5), "mismatch vs reference"

    # Ragged-rows test: rows % block_rows != 0 exercises the masked partial final block
    # and a non-trivial scale.
    xr = jax.random.normal(k1, (26, dim), dtype=jnp.float32)
    sr = jax.random.normal(k2, (dim,), dtype=jnp.float32)
    yr = rmsnorm(xr, sr, eps=1e-6)
    jax.block_until_ready(yr)
    assert jnp.allclose(yr, rmsnorm_ref(xr, sr, eps=1e-6), atol=1e-5, rtol=1e-5), \
        "mismatch vs reference (ragged rows)"

    print("KERNEL_OK")
</pallas_src>

<mosaic_0001>
module attributes {stable_mosaic.version = 11 : i64} {
  func.func @_rmsnorm_kernel(%arg0: i32, %arg1: memref<1x32xf32, #tpu.memory_space<vmem>>, %arg2: memref<8x32xf32, #tpu.memory_space<vmem>>, %arg3: memref<8x32xf32, #tpu.memory_space<vmem>>) attributes {dimension_semantics = [#tpu.dimension_semantics<parallel>], iteration_bounds = array<i64: 2>, scalar_prefetch = 0 : i64, scratch_operands = 0 : i64, tpu.core_type = #tpu.core_type<tc>, window_params = [{pipeline_mode = #tpu.pipeline_mode<synchronous>, transform_indices = @transform_0, window_bounds = array<i64: 1, 32>}, {transform_indices = @transform_1, window_bounds = array<i64: 8, 32>}, {transform_indices = @transform_2, window_bounds = array<i64: 8, 32>}]} {
    %c0 = arith.constant 0 : index
    %c0_0 = arith.constant 0 : index
    %0 = vector.load %arg2[%c0, %c0_0] : memref<8x32xf32, #tpu.memory_space<vmem>>, vector<8x32xf32>
    %1 = arith.mulf %0, %0 : vector<8x32xf32>
    %cst = arith.constant dense<0.000000e+00> : vector<8xf32>
    %2 = vector.multi_reduction <add>, %1, %cst [1] : vector<8x32xf32> to vector<8xf32>
    %3 = vector.shape_cast %2 : vector<8xf32> to vector<8x1xf32>
    %cst_1 = arith.constant 3.200000e+01 : f32
    %4 = vector.broadcast %cst_1 : f32 to vector<8x1xf32>
    %5 = arith.divf %3, %4 : vector<8x1xf32>
    %cst_2 = arith.constant 9.99999997E-7 : f32
    %6 = vector.broadcast %cst_2 : f32 to vector<8x1xf32>
    %7 = arith.addf %5, %6 : vector<8x1xf32>
    %8 = math.rsqrt %7 : vector<8x1xf32>
    %c0_3 = arith.constant 0 : index
    %c0_4 = arith.constant 0 : index
    %9 = vector.load %arg2[%c0_3, %c0_4] : memref<8x32xf32, #tpu.memory_space<vmem>>, vector<8x32xf32>
    %10 = vector.broadcast %8 : vector<8x1xf32> to vector<8x32xf32>
    %11 = arith.mulf %9, %10 : vector<8x32xf32>
    %c0_5 = arith.constant 0 : index
    %c0_6 = arith.constant 0 : index
    %12 = vector.load %arg1[%c0_5, %c0_6] : memref<1x32xf32, #tpu.memory_space<vmem>>, vector<1x32xf32>
    %13 = vector.broadcast %12 : vector<1x32xf32> to vector<8x32xf32>
    %14 = arith.mulf %11, %13 : vector<8x32xf32>
    %c0_7 = arith.constant 0 : index
    %c0_8 = arith.constant 0 : index
    %15 = vector.load %arg3[%c0_7, %c0_8] : memref<8x32xf32, #tpu.memory_space<vmem>>, vector<8x32xf32>
    tpu.vector_store %arg3[%c0_7, %c0_8], %14 {strides = array<i32>} : memref<8x32xf32, #tpu.memory_space<vmem>>, vector<8x32xf32>,
    return
  }
  func.func @transform_0(%arg0: i32) -> (i32, i32) {
    %c0_i32 = arith.constant 0 : i32
    %c0_i32_0 = arith.constant 0 : i32
    %c0_i32_1 = arith.constant 0 : i32
    return %c0_i32, %c0_i32_0 : i32, i32
  }
  func.func @transform_1(%arg0: i32) -> (i32, i32) {
    %c0_i32 = arith.constant 0 : i32
    %c0_i32_0 = arith.constant 0 : i32
    return %arg0, %c0_i32 : i32, i32
  }
  func.func @transform_2(%arg0: i32) -> (i32, i32) {
    %c0_i32 = arith.constant 0 : i32
    %c0_i32_0 = arith.constant 0 : i32
    return %arg0, %c0_i32 : i32, i32
  }
}

</mosaic_0001>

<bundles_post_ra>
// kernel: tpu_custom_call.1
= control target key start
LH: loop header
LB: loop body
LE: loop exit
PB: predicated region body
PF: predicated region fallthrough
CT: control target
= control target key end

     0   :  { %7 = vsyncpa [#allocation3], 0  ;;  %s672_s0 = inlined_call_operand.hbm [shape: f32[1,32], index: 0, kind: input, shape index: {}]   ;;  %s673_s1 = inlined_call_operand.hbm [shape: f32[16,32], index: 1, kind: input, shape index: {}]   ;;  %s674_s2 = inlined_call_operand.hbm [shape: f32[16,32], index: 2, kind: output, shape index: {}]  }
   0x1   :  { %8 = vsyncpa [#allocation6], 0 }
   0x2   :  { %10 = vsyncpa [#allocation6 + $0x1], 0 }
   0x3   :  { %11 = vsyncpa [#allocation4], 0 }
   0x4   :  { %13 = vsyncpa [#allocation4 + $0x1], 0  ;;  %s504_s9 = smov 0   ;;  %s506_s10 = smov 0  }
   0x5   :  { %s508_s11 = smov 0   ;;  %s510_s12 = smov 0  }
   0x6 LB: > { %s525_s13 = sadd.s32 4294967295, %s484_s12   ;;  %s288_s14 = sadd.s32 4294967294, %s484_s12   ;;  %s484_s12 = sphi %s510_s12, %s697_s12   ;;  %s480_s11 = sphi %s508_s11, %s696_s11   ;;  %s476_s10 = sphi %s506_s10, %s695_s10   ;;  %s472_s9 = sphi %s504_s9, %s694_s9  }
   0x7   : > { %p60_p0 = scmp.ne.s32.totalorder %s476_s10, %s472_s9  ;;  %p675_p1 = scmp.eq.s32.totalorder %s525_s13, 0 }
   0x8   : > { %p90_p3 = scmp.eq.s32.totalorder %s288_s14, 1  ;;  %p289_p5 = scmp.ge.s32.totalorder %s484_s12, 1 }
   0x9   : > { %p534_p4 = por %p675_p1, %p60_p0  ;;  %p97_p7 = scmp.lt.s32.totalorder %s484_s12, 3 }
   0xa   : > { %p539_p6 = por %p90_p3, %p60_p0  ;;  %s486_s18 = smov [#allocation2]  }
   0xb   : > { %s679_s15 = scalar_select %p534_p4, 1, 0 }
   0xc   : > { %s680_s16 = scalar_select %p539_p6, 1, 0 }
   0xd   : > { %p544_p8 = pnand %p289_p5, %p97_p7  ;;  %s110_s19 = sshll.u32 %s486_s18, 4  ;;  %s111_s19 = int_to_ptr.vmem [resolvable:$true] %s110_s19 }
   0xe   : > { %s552_s20 = sadd.s32 1, %s484_s12   ;;  %s47_s24 = sadd.s32 1, %s480_s11 }
   0xf   : > { %s681_s17 = scalar_select %p544_p8, 1, 0 }
  0x10   : > { %p311_p10 = pneg %p544_p8  ;;  %s44_s22 = ssub.s32 %s484_s12, %s552_s20 }
  0x11   : > { %p562_p12 = scmp.eq.s32.totalorder %s44_s22, 0  ;;  %p54_p13 = scmp.ne.s32.totalorder %s480_s11, %s476_s10 }
  0x12   : > { %p556_p11 = pnand %p311_p10, %p675_p1  ;;  %s373_s25 = scalar_lea.vmem %s111_s19, 16 }
  0x13   : > { %p374_p3 = scmp.ne.s32.totalorder %s111_s19, %s373_s25  ;;  %s380_s26 = scalar_lea.vmem %s111_s19, 32 }
  0x14   : > { %p364_p0 = pneg %p556_p11  ;;  %p381_p9 = scmp.lt.s32.totalorder %s111_s19, %s111_s19 }
  0x15   : > { %p382_p10 = scmp.lt.s32.totalorder %s380_s26, %s373_s25 }
  0x16   : > { %p376_p5 = pnand %p374_p3, %p364_p0 }
  0x17   : > { %p383_p1 = por %p382_p10, %p381_p9 }
  0x18   : > { %p377_p7 = pneg %p376_p5 }
  0x1a   : > { %p384_p2 = pnand %p383_p1, %p377_p7 }
  0x1c   : > { %387 = shalt.err (!%p384_p2)
}
  0x1d   : > { %314 = dma.hbm_to_vmem [thread:$0]  (!%p556_p11), %s672_s0, 16, %s111_s19, [#allocation3]  }
  0x1e   : > { %s579_s29 = scalar_select %p562_p12, %s480_s11, %s47_s24  }
  0x1f   : > { %p55_p1 = scmp.eq.s32.totalorder %s484_s12, 0  ;;  %p684_p2 = scmp.eq.s32.totalorder %s525_s13, 1 }
  0x20   : > { %p324_p0 = scmp.lt.s32.totalorder %s484_s12, 2  ;;  %s121_s3 = sand.u32 1, %s480_s11  }
  0x21   : > { %p587_p9 = por %p684_p2, %p54_p13  ;;  %p56_p3 = por %p55_p1, %p54_p13 }
  0x22   : > { %s292_s4 = sshll.u32 %s121_s3, 3  ;;  %s293_s5 = sshll.u32 %s484_s12, 7 }
  0x23   : > { %s685_s30 = scalar_select %p587_p9, 1, 0 }
  0x24   : > { %s600_s8 = scalar_lea.hbm %s673_s1, %s293_s5  ;;  %s125_s14 = scalar_lea.vmem [#allocation5], %s292_s4 }
  0x25   : > { %s132_s18 = sshll.u32 %s125_s14, 4  ;;  %p602_p11 = pnand %p324_p0, %p56_p3  ;;  %s133_s18 = int_to_ptr.vmem [resolvable:$true] %s132_s18 }
  0x26   : > { %s122_s21 = scalar_lea.sflag [#allocation6], %s121_s3  ;;  %s388_s22 = scalar_lea.hbm %s600_s8, 128 }
  0x27   : > { %p389_p12 = scmp.ne.s32.totalorder %s600_s8, %s388_s22  ;;  %p390_p13 = pneg %p602_p11 }
  0x28   : > { %s393_s25 = scalar_lea.hbm %s673_s1, 256  ;;  %p394_p10 = scmp.lt.s32.totalorder %s600_s8, %s673_s1 }
  0x29   : > { %p391_p5 = pnand %p390_p13, %p389_p12  ;;  %p395_p1 = scmp.lt.s32.totalorder %s393_s25, %s388_s22 }
  0x2b   : > { %p392_p7 = pneg %p391_p5  ;;  %p396_p2 = por %p395_p1, %p394_p10 }
  0x2d   : > { %p397_p0 = pnand %p396_p2, %p392_p7 }
  0x2f   : > { %400 = shalt.err (!%p397_p0)
}
  0x30   : > { %s401_s28 = scalar_lea.vmem %s133_s18, 128  ;;  %s487_s3 = smov [#allocation5]  }
  0x31   : > { %p402_p3 = scmp.ne.s32.totalorder %s133_s18, %s401_s28  ;;  %s406_s4 = sshll.u32 %s487_s3, 4  ;;  %s407_s4 = int_to_ptr.vmem [resolvable:$false] %s406_s4 }
  0x32   : > { %s408_s5 = scalar_lea.vmem %s407_s4, 256  ;;  %p409_p12 = scmp.lt.s32.totalorder %s133_s18, %s407_s4 }
  0x33   : > { %p404_p6 = pnand %p402_p3, %p390_p13  ;;  %p410_p5 = scmp.lt.s32.totalorder %s408_s5, %s401_s28 }
  0x35   : > { %p405_p9 = pneg %p404_p6  ;;  %p411_p4 = por %p410_p5, %p409_p12 }
  0x37   : > { %p412_p8 = pnand %p411_p4, %p405_p9 }
  0x39   : > { %415 = shalt.err (!%p412_p8)
}
  0x3a   : > { %318 = dma.hbm_to_vmem [thread:$0]  (!%p602_p11), %s600_s8, 128, %s133_s18, %s122_s21  }
  0x3b   : > { %p687_p7 = scmp.ne.s32.totalorder %s681_s17, 0 }
  0x3c   : > { %p688_p10 = scmp.eq.s32.totalorder (!%p687_p7), %s525_s13, 0 }
  0x3d   : > { %141 = sbr.rel (%p687_p7) target bundleno = 248 (0xf8), region = 28 }
  0x42   : > { %459 = dma.done.wait (%p688_p10), [#allocation3], 16   ;;  %p689_p6 = pmov %p688_p10 }
  0x43   : > { %s627_s6 = sand.u32 1, %s476_s10   ;;  %p690_p4 = scmp.ne.s32.totalorder %s679_s15, 0 }
  0x44   : > { %461 = vsyncadd (%p689_p6), [#allocation3], 4294967280  ;;  %s296_s7 = sshll.u32 %s627_s6, 3  ;;  %s148_s14 = scalar_lea.sflag [#allocation6], %s627_s6 }
  0x45   : > { %s151_s19 = scalar_lea.vmem [#allocation5], %s296_s7 }
  0x46   : > { %463 = dma.done.wait (%p690_p4), %s148_s14, 128  }
  0x47   : > { %465 = vsyncadd (%p690_p4), %s148_s14, 4294967168  ;;  %v172_v0 = vld [vmem:[%s151_s19] sm:$0xff]  ;;  %vm174_vm0 = vcmask 261120   ;;  %v298_v7 = vld [vmem:[#allocation2] ss:$0 sm:$0xff]  ;;  %s300_s17 = sshll.u32 %s525_s13, 7 }
  0x48   : > { %v173_v1 = vmul.f32 %v172_v0, %v172_v0  ;;  %s171_s8 = scalar_lea.vmem [#allocation7], %s296_s7  ;;  %s204_s22 = scalar_lea.hbm %s674_s2, %s300_s17 }
  0x49   : > { %s206_s18 = sshll.u32 %s171_s8, 4  ;;  %s193_s23 = scalar_lea.sflag [#allocation4], %s627_s6  ;;  %s207_s18 = int_to_ptr.vmem [resolvable:$true] %s206_s18 }
  0x4a   : > { %v175_v2 = vsel %vm174_vm0, %v173_v1, 0.0  ;;  %s416_s24 = scalar_lea.vmem %s207_s18, 128  ;;  %p691_p9 = scmp.ne.s32.totalorder %s685_s30, 0 }
  0x4b   : > { %176 = vadd.xlane.f32.xlu0 %v175_v2  ;;  %p417_p8 = scmp.ne.s32.totalorder %s207_s18, %s416_s24  ;;  %s488_s25 = smov [#allocation7]  }
  0x4c   : > { %s420_s26 = sshll.u32 %s488_s25, 4  ;;  %s421_s26 = int_to_ptr.vmem [resolvable:$false] %s420_s26 }
  0x4d   : > { %p418_p11 = pnand %p417_p8, %p691_p9  ;;  %s422_s13 = scalar_lea.vmem %s421_s26, 256 }
  0x4e   : > { %p423_p1 = scmp.lt.s32.totalorder %s207_s18, %s421_s26  ;;  %p424_p2 = scmp.lt.s32.totalorder %s422_s13, %s416_s24 }
  0x4f   : > { %p419_p13 = pneg %p418_p11 }
  0x50   : > { %p425_p0 = por %p424_p2, %p423_p1 }
  0x52   : > { %p426_p3 = pnand %p425_p0, %p419_p13 }
  0xd4   : > { %v177_v3 = vpop.xlane.xlu0 %176 }
  0xd5   : > { %v179_v4 = vmul.f32 0.03125, %v177_v3 }
  0xd7   : > { %v180_v5 = vadd.f32 1e-06, %v179_v4 }
  0xd9   : > { %360 = vrsqrt.f32 %v180_v5 }
  0xe6   : > { %v361_v6 = vpop.eup %360 }
  0xe7   : > { %v182_v8 = vmul.f32 %v361_v6, %v172_v0 }
  0xe9   : > { %v190_v9 = vmul.f32 %v298_v7, %v182_v8 }
  0xeb   : > { %191 = vst.msk [vmem:[%s171_s8] sm:$0xff] %vm174_vm0, %v190_v9 }
  0xec   : > { %429 = shalt.err (!%p426_p3)
}
  0xed   : > { %s430_s27 = scalar_lea.hbm %s204_s22, 128  ;;  %s434_s4 = scalar_lea.hbm %s674_s2, 256 }
  0xee   : > { %p431_p12 = scmp.ne.s32.totalorder %s204_s22, %s430_s27  ;;  %p435_p10 = scmp.lt.s32.totalorder %s204_s22, %s674_s2 }
  0xef   : > { %p436_p6 = scmp.lt.s32.totalorder %s434_s4, %s430_s27 }
  0xf0   : > { %p432_p5 = pnand %p431_p12, %p691_p9 }
  0xf1   : > { %p437_p4 = por %p436_p6, %p435_p10 }
  0xf2   : > { %p433_p7 = pneg %p432_p5 }
  0xf4   : > { %p438_p8 = pnand %p437_p4, %p433_p7 }
  0xf6   : > { %441 = shalt.err (!%p438_p8)
}
  0xf7   : > { %309 = dma.vmem_to_hbm [thread:$0]  (%p691_p9), %s207_s18, 128, %s204_s22, %s193_s23  }
  0xf8 PF: > { %s218_s7 = sand.u32 1, %s472_s9   ;;  %p692_p11 = scmp.ne.s32.totalorder %s680_s16, 0 }
  0xf9   : > { %p693_p13 = scmp.ge.s32.totalorder %s484_s12, 2  ;;  %s219_s14 = scalar_lea.sflag [#allocation4], %s218_s7 }
  0xfb   : > { %p320_p1 = pnand %p693_p13, %p692_p11 }
  0xfd   : > { %p321_p2 = pneg %p320_p1 }
  0xff   : > { %467 = dma.done.wait (%p321_p2), %s219_s14, 128  }
 0x100   : > { %469 = vsyncadd (%p321_p2), %s219_s14, 4294967168  ;;  %p16_p0 = scmp.ge.s32.totalorder %s552_s20, 4   ;;  %s694_s9 = smov %s476_s10 }
 0x101   : > { %s695_s10 = smov %s480_s11  ;;  %s696_s11 = smov %s579_s29 }
 0x102   : > { %s697_s12 = smov %s552_s20  ;;  %18 = sbr.rel (!%p16_p0) target bundleno = 6 (0x6), region = 78 }
 0x107   :  { %224 = vsyncpa [#allocation3], 1 }
 0x108   :  { %226 = vsyncpa [#allocation3 + $0x1], 1 }
 0x109   :  { %227 = vsyncpa [#allocation6], 1 }
 0x10a   :  { %229 = vsyncpa [#allocation6 + $0x1], 1 }
 0x10b   :  { %230 = vsyncpa [#allocation4], 1 }
 0x10c   :  { %232 = vsyncpa [#allocation4 + $0x1], 1 }

</bundles_post_ra>
